<compile_context>
chip_gen: v6e
topology: v6e:2x2x1
jax: 0.10.0
libtpu: 0.0.40
codegen_flags: <defaults>
</compile_context>

<pallas_src>
import jax
import jax.numpy as jnp
from jax.experimental import pallas as pl
from jax.experimental.pallas import tpu as pltpu

_MIB = 1024 * 1024
_ROW_ALIGN = 32  # multiple of every packed-dtype sublane tiling (8 / 16 / 32)


def _vmem_capacity_bytes():
    """Physical VMEM of the current generation (v5e/v6e 128 MiB, v7x 64 MiB)."""
    try:
        return int(pltpu.get_tpu_info().vmem_capacity_bytes)
    except Exception:  # pragma: no cover - conservative (v7x-sized) fallback
        return 64 * _MIB


def _dma_copy_kernel(src_ref, out_ref, sem):
    # float32 source: the "render" is a pure pass-through.  One HBM->HBM DMA;
    # the TensorCore stays free for surrounding work.
    cp = pltpu.make_async_copy(src_ref, out_ref, sem)
    cp.start()
    cp.wait()


def _cast_copy_kernel(src_ref, out_ref):
    # Non-f32 source: elementwise cast into the f32 result tile (VPU).
    out_ref[...] = src_ref[...].astype(jnp.float32)


def _lane_dense_view(n):
    """2D (rows, cols, pad) view of the flat length-n pixel stream with a
    lane-dense (multiple-of-128) last dim; pads when n is not 128-divisible."""
    for cols in (4096, 2048, 1024, 512, 256, 128):
        if n % cols == 0:
            return n // cols, cols, 0
    # Pad to lane-dense instead of emitting masked vst.msk tail stores.
    cols = 512
    n_pad = pl.cdiv(n, cols) * cols
    return n_pad // cols, cols, n_pad - n


def dummy_diff_render(source_img, height, width):
    """Pallas equivalent of _DummyDiffRender.apply(source_img, height, width, app).

    source_img: (height, width, 3) array (any float/integer dtype).
    Returns:    (height, width, 3) float32 result image (fresh buffer).
    """
    assert source_img.shape == (height, width, 3), (
        f"expected (H, W, 3) = ({height}, {width}, 3), got {source_img.shape}"
    )

    n = height * width * 3

    # ---------- fast path: source already float32 -> single HBM->HBM DMA ----
    if source_img.dtype == jnp.float32:
        return pl.pallas_call(
            _dma_copy_kernel,
            out_shape=jax.ShapeDtypeStruct((height, width, 3), jnp.float32),
            in_specs=[pl.BlockSpec(memory_space=pl.ANY)],
            out_specs=pl.BlockSpec(memory_space=pl.ANY),
            scratch_shapes=[pltpu.SemaphoreType.DMA],
            cost_estimate=pl.CostEstimate(
                flops=0, transcendentals=0, bytes_accessed=2 * n * 4
            ),
        )(source_img)

    # ---------- cast path: lane-dense tiled copy/cast ------------------------
    rows, cols, pad = _lane_dense_view(n)
    flat = source_img.reshape(-1)
    if pad:
        flat = jnp.pad(flat, (0, pad))
    src2d = flat.reshape(rows, cols)

    src_item = src2d.dtype.itemsize
    out_item = 4
    vmem_cap = _vmem_capacity_bytes()

    # ~8 MiB of f32 output per grid step (clamped by the generation's VMEM).
    target_tile_bytes = min(8 * _MIB, vmem_cap // 8)
    tile_rows = (target_tile_bytes // (cols * out_item)) // _ROW_ALIGN * _ROW_ALIGN
    tile_rows = max(tile_rows, _ROW_ALIGN)
    # Keep at least ~8 grid steps for big images so v7x's 2 TensorCores both
    # get work under dimension_semantics=("parallel",).
    if rows >= 8 * _ROW_ALIGN:
        cap = max(_ROW_ALIGN, (rows // 8) // _ROW_ALIGN * _ROW_ALIGN)
        tile_rows = min(tile_rows, cap)
    if tile_rows >= rows:
        tile_rows = rows  # single full-extent block (exempt from 8-divisibility)

    grid = (pl.cdiv(rows, tile_rows),)
    block = pl.BlockSpec((tile_rows, cols), lambda i: (i, 0))

    # VMEM limit derived from the actual double-buffered footprint + margin,
    # capped at 3/4 of the generation's physical VMEM.
    db_bytes = 2 * tile_rows * cols * (src_item + out_item)
    vmem_limit = int(min(vmem_cap * 3 // 4, max(db_bytes + 8 * _MIB, 32 * _MIB)))

    out2d = pl.pallas_call(
        _cast_copy_kernel,
        out_shape=jax.ShapeDtypeStruct((rows, cols), jnp.float32),
        grid=grid,
        in_specs=[block],
        out_specs=block,
        compiler_params=pltpu.CompilerParams(
            dimension_semantics=("parallel",),
            vmem_limit_bytes=vmem_limit,
        ),
        cost_estimate=pl.CostEstimate(
            flops=0,
            transcendentals=0,
            bytes_accessed=rows * cols * (src_item + out_item),
        ),
    )(src2d)

    out_flat = out2d.reshape(-1)
    if pad:
        out_flat = out_flat[:n]
    return out_flat.reshape(height, width, 3)


if __name__ == "__main__":
    key = jax.random.PRNGKey(0)
    k1, k2, k3 = jax.random.split(key, 3)

    # Case 1: float32 source -> HBM->HBM DMA fast path.
    h1, w1 = 16, 16
    src1 = jax.random.normal(k1, (h1, w1, 3), dtype=jnp.float32)
    res1 = dummy_diff_render(src1, h1, w1)
    jax.block_until_ready(res1)
    assert res1.shape == (h1, w1, 3)
    assert res1.dtype == jnp.float32
    assert bool(jnp.allclose(res1, src1))

    # Case 2: bf16 source, 128-divisible flat size -> tiled lane-dense cast path.
    h2, w2 = 16, 16
    src2 = jax.random.normal(k2, (h2, w2, 3), dtype=jnp.bfloat16)
    res2 = dummy_diff_render(src2, h2, w2)
    jax.block_until_ready(res2)
    assert res2.shape == (h2, w2, 3)
    assert res2.dtype == jnp.float32
    assert bool(jnp.allclose(res2, src2.astype(jnp.float32)))

    # Case 3: bf16 source, non-128-divisible flat size -> pad-to-lane-dense path.
    h3, w3 = 17, 5
    src3 = jax.random.normal(k3, (h3, w3, 3), dtype=jnp.bfloat16)
    res3 = dummy_diff_render(src3, h3, w3)
    jax.block_until_ready(res3)
    assert res3.shape == (h3, w3, 3)
    assert res3.dtype == jnp.float32
    assert bool(jnp.allclose(res3, src3.astype(jnp.float32)))

    print("KERNEL_OK")
</pallas_src>

<mosaic_0001>
module attributes {stable_mosaic.version = 11 : i64} {
  func.func @_dma_copy_kernel(%arg0: memref<16x16x3xf32, #tpu.memory_space<any>>, %arg1: memref<16x16x3xf32, #tpu.memory_space<any>>, %arg2: memref<!tpu.dma_semaphore, #tpu.memory_space<semaphore_mem>>) attributes {dimension_semantics = [], scalar_prefetch = 0 : i64, scratch_operands = 1 : i64, tpu.core_type = #tpu.core_type<tc>} {
    tpu.enqueue_dma source(%arg0 : memref<16x16x3xf32, #tpu.memory_space<any>>) target(%arg1 : memref<16x16x3xf32, #tpu.memory_space<any>>) target_semaphore(%arg2 : memref<!tpu.dma_semaphore, #tpu.memory_space<semaphore_mem>>)
    tpu.wait_dma2 semaphore(%arg2 : memref<!tpu.dma_semaphore, #tpu.memory_space<semaphore_mem>>) src(%arg0 : memref<16x16x3xf32, #tpu.memory_space<any>>) dst(%arg1 : memref<16x16x3xf32, #tpu.memory_space<any>>)
    return
  }
}

</mosaic_0001>

<bundles_post_ra>
// kernel: tpu_custom_call.1
= control target key start
LH: loop header
LB: loop body
LE: loop exit
PB: predicated region body
PF: predicated region fallthrough
CT: control target
= control target key end

     0   :  { %s334_s0 = inlined_call_operand.vmem [shape: f32[16,16,3], index: 0, kind: input, shape index: {}]   ;;  %s335_s1 = inlined_call_operand.vmem [shape: f32[16,16,3], index: 1, kind: output, shape index: {}]  }
   0x1   :  { %v39_v0 = vld [vmem:[%s334_s0] sm:$0xff]  ;;  %v41_v1 = vld [vmem:[%s334_s0 + $0x8] sm:$0xff]  ;;  %v43_v2 = vld [vmem:[%s334_s0 + $0x10] sm:$0xff] }
   0x2   :  { %40 = vst [vmem:[%s335_s1] sm:$0xff] %v39_v0  ;;  %42 = vst [vmem:[%s335_s1 + $0x8] sm:$0xff] %v41_v1  ;;  %v45_v3 = vld [vmem:[%s334_s0 + $0x18] sm:$0xff]  ;;  %v47_v4 = vld [vmem:[%s334_s0 + $0x20] sm:$0xff] }
   0x3   :  { %44 = vst [vmem:[%s335_s1 + $0x10] sm:$0xff] %v43_v2  ;;  %v49_v5 = vld [vmem:[%s334_s0 + $0x28] sm:$0xff]  ;;  %46 = vst [vmem:[%s335_s1 + $0x18] sm:$0xff] %v45_v3  ;;  %v51_v6 = vld [vmem:[%s334_s0 + $0x30] sm:$0xff] }
   0x4   :  { %48 = vst [vmem:[%s335_s1 + $0x20] sm:$0xff] %v47_v4  ;;  %50 = vst [vmem:[%s335_s1 + $0x28] sm:$0xff] %v49_v5  ;;  %v53_v7 = vld [vmem:[%s334_s0 + $0x38] sm:$0xff]  ;;  %v55_v8 = vld [vmem:[%s334_s0 + $0x40] sm:$0xff] }
   0x5   :  { %52 = vst [vmem:[%s335_s1 + $0x30] sm:$0xff] %v51_v6  ;;  %54 = vst [vmem:[%s335_s1 + $0x38] sm:$0xff] %v53_v7  ;;  %v57_v9 = vld [vmem:[%s334_s0 + $0x48] sm:$0xff]  ;;  %v59_v10 = vld [vmem:[%s334_s0 + $0x50] sm:$0xff] }
   0x6   :  { %56 = vst [vmem:[%s335_s1 + $0x40] sm:$0xff] %v55_v8  ;;  %v61_v11 = vld [vmem:[%s334_s0 + $0x58] sm:$0xff]  ;;  %58 = vst [vmem:[%s335_s1 + $0x48] sm:$0xff] %v57_v9  ;;  %v63_v12 = vld [vmem:[%s334_s0 + $0x60] sm:$0xff] }
   0x7   :  { %60 = vst [vmem:[%s335_s1 + $0x50] sm:$0xff] %v59_v10  ;;  %62 = vst [vmem:[%s335_s1 + $0x58] sm:$0xff] %v61_v11  ;;  %v65_v13 = vld [vmem:[%s334_s0 + $0x68] sm:$0xff]  ;;  %v67_v14 = vld [vmem:[%s334_s0 + $0x70] sm:$0xff] }
   0x8   :  { %64 = vst [vmem:[%s335_s1 + $0x60] sm:$0xff] %v63_v12  ;;  %66 = vst [vmem:[%s335_s1 + $0x68] sm:$0xff] %v65_v13  ;;  %v69_v15 = vld [vmem:[%s334_s0 + $0x78] sm:$0xff]  ;;  %v71_v16 = vld [vmem:[%s334_s0 + $0x80] sm:$0xff] }
   0x9   :  { %68 = vst [vmem:[%s335_s1 + $0x70] sm:$0xff] %v67_v14  ;;  %v73_v17 = vld [vmem:[%s334_s0 + $0x88] sm:$0xff]  ;;  %70 = vst [vmem:[%s335_s1 + $0x78] sm:$0xff] %v69_v15  ;;  %v75_v18 = vld [vmem:[%s334_s0 + $0x90] sm:$0xff] }
   0xa   :  { %72 = vst [vmem:[%s335_s1 + $0x80] sm:$0xff] %v71_v16  ;;  %74 = vst [vmem:[%s335_s1 + $0x88] sm:$0xff] %v73_v17  ;;  %v77_v19 = vld [vmem:[%s334_s0 + $0x98] sm:$0xff]  ;;  %v79_v20 = vld [vmem:[%s334_s0 + $0xa0] sm:$0xff] }
   0xb   :  { %76 = vst [vmem:[%s335_s1 + $0x90] sm:$0xff] %v75_v18  ;;  %78 = vst [vmem:[%s335_s1 + $0x98] sm:$0xff] %v77_v19  ;;  %v81_v21 = vld [vmem:[%s334_s0 + $0xa8] sm:$0xff]  ;;  %v83_v22 = vld [vmem:[%s334_s0 + $0xb0] sm:$0xff] }
   0xc   :  { %80 = vst [vmem:[%s335_s1 + $0xa0] sm:$0xff] %v79_v20  ;;  %v85_v23 = vld [vmem:[%s334_s0 + $0xb8] sm:$0xff]  ;;  %82 = vst [vmem:[%s335_s1 + $0xa8] sm:$0xff] %v81_v21  ;;  %v87_v24 = vld [vmem:[%s334_s0 + $0xc0] sm:$0xff] }
   0xd   :  { %84 = vst [vmem:[%s335_s1 + $0xb0] sm:$0xff] %v83_v22  ;;  %86 = vst [vmem:[%s335_s1 + $0xb8] sm:$0xff] %v85_v23  ;;  %v89_v25 = vld [vmem:[%s334_s0 + $0xc8] sm:$0xff]  ;;  %v91_v26 = vld [vmem:[%s334_s0 + $0xd0] sm:$0xff] }
   0xe   :  { %88 = vst [vmem:[%s335_s1 + $0xc0] sm:$0xff] %v87_v24  ;;  %90 = vst [vmem:[%s335_s1 + $0xc8] sm:$0xff] %v89_v25  ;;  %v93_v27 = vld [vmem:[%s334_s0 + $0xd8] sm:$0xff]  ;;  %v95_v28 = vld [vmem:[%s334_s0 + $0xe0] sm:$0xff] }
   0xf   :  { %92 = vst [vmem:[%s335_s1 + $0xd0] sm:$0xff] %v91_v26  ;;  %v97_v29 = vld [vmem:[%s334_s0 + $0xe8] sm:$0xff]  ;;  %94 = vst [vmem:[%s335_s1 + $0xd8] sm:$0xff] %v93_v27  ;;  %v99_v30 = vld [vmem:[%s334_s0 + $0xf0] sm:$0xff] }
  0x10   :  { %96 = vst [vmem:[%s335_s1 + $0xe0] sm:$0xff] %v95_v28  ;;  %98 = vst [vmem:[%s335_s1 + $0xe8] sm:$0xff] %v97_v29  ;;  %v101_v31 = vld [vmem:[%s334_s0 + $0xf8] sm:$0xff] }
  0x11   :  { %100 = vst [vmem:[%s335_s1 + $0xf0] sm:$0xff] %v99_v30  ;;  %102 = vst [vmem:[%s335_s1 + $0xf8] sm:$0xff] %v101_v31 }
  0x12   :  { %110 = vsyncadd [#allocation2], 4096 }
  0x13   :  { %130 = dma.done.wait [#allocation2], 4096 }
  0x14   :  { %131 = vsyncadd [#allocation2], 4294963200 }
  0x15   :  { %115 = vsyncmov [#allocation2] }
  0x18   :  { %s116_s18 = vpop.sfrf %115 }
  0x19   :  { %p129_p0 = scmp.ne.s32.totalorder %s116_s18, 0 }
  0x1b   :  { %120 = shalt.err (%p129_p0)  }

</bundles_post_ra>
